<compile_context>
chip_gen: v5e
topology: v5e:2x2
jax: 0.10.0
libtpu: 0.0.40
codegen_flags: <defaults>
</compile_context>

<pallas_src>
import functools

import jax
import jax.numpy as jnp
from jax import lax
from jax.experimental import pallas as pl
from jax.experimental.pallas import tpu as pltpu


def _round_up(x, m):
    return ((x + m - 1) // m) * m


# ---------------------------------------------------------------------------
# Pallas kernel.  Grid = (N, C_out_pad // tn, K_pad // tk)
#   patches_ref : (1, P_pad, tk)  bf16/f32 im2col patches tile for this sample
#   w_ref       : (tk, tn)        weight tile
#   b_ref       : (1, tn)         bias tile (f32; only used when use_norm=False)
#   o_ref       : (1, P_pad, tn)  output tile (f32)
#   acc_ref     : (P_pad, tn)     f32 VMEM accumulator (resident across the K axis)
# ---------------------------------------------------------------------------
def _disc_conv_block_kernel(patches_ref, w_ref, b_ref, o_ref, acc_ref,
                            *, use_norm, eps, slope, p_true):
    kk = pl.program_id(2)

    @pl.when(kk == 0)
    def _init():
        acc_ref[...] = jnp.zeros_like(acc_ref)

    acc_ref[...] += jnp.dot(patches_ref[0], w_ref[...],
                            preferred_element_type=jnp.float32)

    @pl.when(kk == pl.num_programs(2) - 1)
    def _finalize():
        y = acc_ref[...]                                  # (P_pad, tn) f32
        if use_norm:
            # InstanceNorm2d (affine=False): per-channel stats over the spatial dim.
            # One-pass stats: var = E[y^2] - mean^2.  Padded spatial rows are exact
            # zeros (zero patches, no bias), so they contribute nothing to the sums;
            # we normalize by the true spatial count p_true.
            inv_p = 1.0 / float(p_true)
            s = jnp.sum(y, axis=0, keepdims=True)         # (1, tn)
            ss = jnp.sum(y * y, axis=0, keepdims=True)    # (1, tn)
            mean = s * inv_p
            var = jnp.maximum(ss * inv_p - mean * mean, 0.0)
            y = (y - mean) * lax.rsqrt(var + eps)
        else:
            # Bias is a no-op under InstanceNorm; only add it on the no-norm path.
            y = y + b_ref[...]
        y = jnp.where(y >= 0, y, slope * y)               # LeakyReLU(0.2)
        o_ref[0] = y.astype(o_ref.dtype)


def _im2col(x_nchw, k=4, s=2, p=1):
    """Extract k x k patches with stride s, padding p.  Returns (N, P, C*k*k)."""
    N, C, H, W = x_nchw.shape
    xp = jnp.pad(x_nchw, ((0, 0), (0, 0), (p, p), (p, p)))
    Ho = (H + 2 * p - k) // s + 1
    Wo = (W + 2 * p - k) // s + 1
    pats = jnp.stack(
        [xp[:, :, di:di + (Ho - 1) * s + 1:s, dj:dj + (Wo - 1) * s + 1:s]
         for di in range(k) for dj in range(k)],
        axis=2,
    )                                                     # (N, C, k*k, Ho, Wo)
    pats = pats.reshape(N, C, k, k, Ho, Wo)
    pats = jnp.transpose(pats, (0, 4, 5, 1, 2, 3))        # (N, Ho, Wo, C, k, k)
    return pats.reshape(N, Ho * Wo, C * k * k), Ho, Wo


def disc_conv_block(x_nchw, weight, bias, *, stride=2, is_first=False,
                    compute_dtype=jnp.bfloat16):
    """Pallas implementation of DiscConvBlock.forward.

    x_nchw : (N, C_in, H, W) float32
    weight : (C_out, C_in, 4, 4) float32   (PyTorch Conv2d layout)
    bias   : (C_out,) float32
    compute_dtype : dtype of the MXU operands (accumulation is always f32).
    """
    N, C_in, H, W = x_nchw.shape
    C_out = weight.shape[0]
    ksz = 4

    patches, Ho, Wo = _im2col(x_nchw, k=ksz, s=stride, p=1)   # (N, P, K) f32
    P = Ho * Wo
    K = C_in * ksz * ksz

    # Tile sizes: lane-dense 128-wide C_out tiles (MXU-friendly on v5e and up),
    # K tiles of up to 512 (multiple of 128).
    tn = 128
    tk = min(512, _round_up(K, 128))

    P_pad = _round_up(P, 16)
    K_pad = _round_up(K, tk)
    C_pad = _round_up(C_out, tn)

    # Pad (zeros) and cast the MXU operands.  Zero-padded K rows / C_out columns /
    # spatial rows contribute nothing (or are sliced off below).
    patches = jnp.pad(patches, ((0, 0), (0, P_pad - P), (0, K_pad - K)))
    patches = patches.astype(compute_dtype)

    w_mat = weight.reshape(C_out, K).T                        # (K, C_out)
    w_mat = jnp.pad(w_mat, ((0, K_pad - K), (0, C_pad - C_out))).astype(compute_dtype)
    b_mat = jnp.pad(bias, (0, C_pad - C_out)).reshape(1, C_pad).astype(jnp.float32)

    grid = (N, C_pad // tn, K_pad // tk)

    kernel = functools.partial(
        _disc_conv_block_kernel,
        use_norm=not is_first,
        eps=1e-5,
        slope=0.2,
        p_true=P,
    )

    out = pl.pallas_call(
        kernel,
        out_shape=jax.ShapeDtypeStruct((N, P_pad, C_pad), jnp.float32),
        grid_spec=pltpu.PrefetchScalarGridSpec(
            num_scalar_prefetch=0,
            grid=grid,
            in_specs=[
                pl.BlockSpec((1, P_pad, tk), lambda n, j, kk: (n, 0, kk)),
                pl.BlockSpec((tk, tn), lambda n, j, kk: (kk, j)),
                pl.BlockSpec((1, tn), lambda n, j, kk: (0, j)),
            ],
            out_specs=pl.BlockSpec((1, P_pad, tn), lambda n, j, kk: (n, 0, j)),
            scratch_shapes=[pltpu.VMEM((P_pad, tn), jnp.float32)],
        ),
        compiler_params=pltpu.CompilerParams(
            dimension_semantics=("parallel", "parallel", "arbitrary"),
            vmem_limit_bytes=48 * 1024 * 1024,
        ),
    )(patches, w_mat, b_mat)

    # Strip padding, back to PyTorch NCHW (kept for interface parity with the module;
    # downstream fusion could keep the channels-last (N, P, C) layout instead).
    out = out[:, :P, :C_out]
    return jnp.transpose(out.reshape(N, Ho, Wo, C_out), (0, 3, 1, 2))


# ---------------------------------------------------------------------------
# Pure-JAX reference (correctness check only).
# ---------------------------------------------------------------------------
def _reference(x, weight, bias, *, stride=2, is_first=False):
    y = lax.conv_general_dilated(
        x, weight, window_strides=(stride, stride), padding=((1, 1), (1, 1)),
        dimension_numbers=("NCHW", "OIHW", "NCHW"),
    ) + bias.reshape(1, -1, 1, 1)
    if not is_first:
        mean = jnp.mean(y, axis=(2, 3), keepdims=True)
        var = jnp.mean((y - mean) ** 2, axis=(2, 3), keepdims=True)
        y = (y - mean) * lax.rsqrt(var + 1e-5)
    return jnp.where(y >= 0, y, 0.2 * y)


if __name__ == "__main__":
    key = jax.random.PRNGKey(0)
    k_x, k_w, k_b = jax.random.split(key, 3)

    N, C_in, C_out, Hs = 2, 4, 8, 16
    x = jax.random.normal(k_x, (N, C_in, Hs, Hs), dtype=jnp.float32)
    fan_in = C_in * 4 * 4
    bound = 1.0 / (fan_in ** 0.5)
    weight = jax.random.uniform(k_w, (C_out, C_in, 4, 4), jnp.float32, -bound, bound)
    bias = jax.random.uniform(k_b, (C_out,), jnp.float32, -bound, bound)

    # 1) f32 operand path: tight check against the f32 reference (norm branch).
    out32 = jax.block_until_ready(
        disc_conv_block(x, weight, bias, stride=2, is_first=False,
                        compute_dtype=jnp.float32))
    ref32 = _reference(x, weight, bias, stride=2, is_first=False)
    assert out32.shape == (N, C_out, Hs // 2, Hs // 2), out32.shape
    assert jnp.allclose(out32, ref32, atol=1e-4, rtol=1e-4), \
        float(jnp.max(jnp.abs(out32 - ref32)))

    # 2) is_first path (no norm, bias added), f32 operands.
    out_f = jax.block_until_ready(
        disc_conv_block(x, weight, bias, stride=2, is_first=True,
                        compute_dtype=jnp.float32))
    ref_f = _reference(x, weight, bias, stride=2, is_first=True)
    assert jnp.allclose(out_f, ref_f, atol=1e-4, rtol=1e-4), \
        float(jnp.max(jnp.abs(out_f - ref_f)))

    # 3) Default bf16-operand path: compare against the reference run on
    #    bf16-rounded inputs (same quantization, f32 math).
    out_bf = jax.block_until_ready(
        disc_conv_block(x, weight, bias, stride=2, is_first=False))
    x_q = x.astype(jnp.bfloat16).astype(jnp.float32)
    w_q = weight.astype(jnp.bfloat16).astype(jnp.float32)
    ref_bf = _reference(x_q, w_q, bias, stride=2, is_first=False)
    assert out_bf.shape == (N, C_out, Hs // 2, Hs // 2), out_bf.shape
    assert jnp.allclose(out_bf, ref_bf, atol=2e-3, rtol=2e-3), \
        float(jnp.max(jnp.abs(out_bf - ref_bf)))

    print("KERNEL_OK")
</pallas_src>

<mosaic_0001>
module attributes {stable_mosaic.version = 11 : i64} {
  func.func @_disc_conv_block_kernel(%arg0: i32, %arg1: i32, %arg2: i32, %arg3: memref<1x64x128xf32, #tpu.memory_space<vmem>>, %arg4: memref<128x128xf32, #tpu.memory_space<vmem>>, %arg5: memref<1x128xf32, #tpu.memory_space<vmem>>, %arg6: memref<1x64x128xf32, #tpu.memory_space<vmem>>, %arg7: memref<64x128xf32, #tpu.memory_space<vmem>>) attributes {dimension_semantics = [#tpu.dimension_semantics<parallel>, #tpu.dimension_semantics<parallel>, #tpu.dimension_semantics<arbitrary>], iteration_bounds = array<i64: 2, 1, 1>, scalar_prefetch = 0 : i64, scratch_operands = 1 : i64, tpu.core_type = #tpu.core_type<tc>, window_params = [{transform_indices = @transform_0, window_bounds = array<i64: 1, 64, 128>}, {transform_indices = @transform_1, window_bounds = array<i64: 128, 128>}, {transform_indices = @transform_2, window_bounds = array<i64: 1, 128>}, {transform_indices = @transform_3, window_bounds = array<i64: 1, 64, 128>}]} {
    %c0_i32 = arith.constant 0 : i32
    %0 = arith.cmpi eq, %arg2, %c0_i32 : i32
    %1 = arith.extui %0 : i1 to i32
    %c0_i32_0 = arith.constant 0 : i32
    %2 = arith.cmpi ne, %1, %c0_i32_0 : i32
    scf.if %2 {
      %cst_11 = arith.constant 0.000000e+00 : f32
      %13 = vector.broadcast %cst_11 : f32 to vector<64x128xf32>
      %c0_12 = arith.constant 0 : index
      %c0_13 = arith.constant 0 : index
      %14 = vector.load %arg7[%c0_12, %c0_13] : memref<64x128xf32, #tpu.memory_space<vmem>>, vector<64x128xf32>
      tpu.vector_store %arg7[%c0_12, %c0_13], %13 {strides = array<i32>} : memref<64x128xf32, #tpu.memory_space<vmem>>, vector<64x128xf32>,
    } else {
    }
    %c0 = arith.constant 0 : index
    %c0_1 = arith.constant 0 : index
    %3 = vector.load %arg7[%c0, %c0_1] : memref<64x128xf32, #tpu.memory_space<vmem>>, vector<64x128xf32>
    %c0_2 = arith.constant 0 : index
    %c0_3 = arith.constant 0 : index
    %c0_4 = arith.constant 0 : index
    %4 = vector.load %arg3[%c0_2, %c0_3, %c0_4] : memref<1x64x128xf32, #tpu.memory_space<vmem>>, vector<1x64x128xf32>
    %5 = vector.shape_cast %4 : vector<1x64x128xf32> to vector<64x128xf32>
    %c0_5 = arith.constant 0 : index
    %c0_6 = arith.constant 0 : index
    %6 = vector.load %arg4[%c0_5, %c0_6] : memref<128x128xf32, #tpu.memory_space<vmem>>, vector<128x128xf32>
    %cst = arith.constant dense<0.000000e+00> : vector<64x128xf32>
    %7 = tpu.matmul %5, %6, %cst {dimension_numbers = #tpu.dot_dimension_numbers<[1], [0], [0], [1], [0, 0, 1, 1], [], []>} : vector<64x128xf32>, vector<128x128xf32>, vector<64x128xf32> -> vector<64x128xf32>
    %8 = arith.addf %3, %7 : vector<64x128xf32>
    %c0_7 = arith.constant 0 : index
    %c0_8 = arith.constant 0 : index
    %9 = vector.load %arg7[%c0_7, %c0_8] : memref<64x128xf32, #tpu.memory_space<vmem>>, vector<64x128xf32>
    tpu.vector_store %arg7[%c0_7, %c0_8], %8 {strides = array<i32>} : memref<64x128xf32, #tpu.memory_space<vmem>>, vector<64x128xf32>,
    %c0_i32_9 = arith.constant 0 : i32
    %10 = arith.cmpi eq, %arg2, %c0_i32_9 : i32
    %11 = arith.extui %10 : i1 to i32
    %c0_i32_10 = arith.constant 0 : i32
    %12 = arith.cmpi ne, %11, %c0_i32_10 : i32
    scf.if %12 {
      %c0_11 = arith.constant 0 : index
      %c0_12 = arith.constant 0 : index
      %13 = vector.load %arg7[%c0_11, %c0_12] : memref<64x128xf32, #tpu.memory_space<vmem>>, vector<64x128xf32>
      %cst_13 = arith.constant dense<0.000000e+00> : vector<128xf32>
      %14 = vector.multi_reduction <add>, %13, %cst_13 [0] : vector<64x128xf32> to vector<128xf32>
      %15 = vector.shape_cast %14 : vector<128xf32> to vector<1x128xf32>
      %16 = arith.mulf %13, %13 : vector<64x128xf32>
      %cst_14 = arith.constant dense<0.000000e+00> : vector<128xf32>
      %17 = vector.multi_reduction <add>, %16, %cst_14 [0] : vector<64x128xf32> to vector<128xf32>
      %18 = vector.shape_cast %17 : vector<128xf32> to vector<1x128xf32>
      %cst_15 = arith.constant 1.562500e-02 : f32
      %19 = vector.broadcast %cst_15 : f32 to vector<1x128xf32>
      %20 = arith.mulf %15, %19 : vector<1x128xf32>
      %cst_16 = arith.constant 1.562500e-02 : f32
      %21 = vector.broadcast %cst_16 : f32 to vector<1x128xf32>
      %22 = arith.mulf %18, %21 : vector<1x128xf32>
      %23 = arith.mulf %20, %20 : vector<1x128xf32>
      %24 = arith.subf %22, %23 : vector<1x128xf32>
      %cst_17 = arith.constant 0.000000e+00 : f32
      %25 = vector.broadcast %cst_17 : f32 to vector<1x128xf32>
      %26 = arith.maximumf %24, %25 : vector<1x128xf32>
      %27 = vector.broadcast %20 : vector<1x128xf32> to vector<64x128xf32>
      %28 = arith.subf %13, %27 : vector<64x128xf32>
      %cst_18 = arith.constant 9.99999974E-6 : f32
      %29 = vector.broadcast %cst_18 : f32 to vector<1x128xf32>
      %30 = arith.addf %26, %29 : vector<1x128xf32>
      %31 = math.rsqrt %30 : vector<1x128xf32>
      %32 = vector.broadcast %31 : vector<1x128xf32> to vector<64x128xf32>
      %33 = arith.mulf %28, %32 : vector<64x128xf32>
      %cst_19 = arith.constant 0.000000e+00 : f32
      %34 = vector.broadcast %cst_19 : f32 to vector<64x128xf32>
      %35 = arith.cmpf oge, %33, %34 : vector<64x128xf32>
      %cst_20 = arith.constant 2.000000e-01 : f32
      %36 = vector.broadcast %cst_20 : f32 to vector<64x128xf32>
      %37 = arith.mulf %36, %33 : vector<64x128xf32>
      %38 = arith.select %35, %33, %37 : vector<64x128xi1>, vector<64x128xf32>
      %c0_21 = arith.constant 0 : index
      %c0_22 = arith.constant 0 : index
      %c0_23 = arith.constant 0 : index
      %39 = vector.load %arg6[%c0_21, %c0_22, %c0_23] : memref<1x64x128xf32, #tpu.memory_space<vmem>>, vector<1x64x128xf32>
      %40 = vector.shape_cast %39 : vector<1x64x128xf32> to vector<64x128xf32>
      %41 = vector.shape_cast %38 : vector<64x128xf32> to vector<1x64x128xf32>
      tpu.vector_store %arg6[%c0_21, %c0_22, %c0_23], %41 {strides = array<i32>} : memref<1x64x128xf32, #tpu.memory_space<vmem>>, vector<1x64x128xf32>,
    } else {
    }
    return
  }
  func.func @transform_0(%arg0: i32, %arg1: i32, %arg2: i32) -> (i32, i32, i32) {
    %c0_i32 = arith.constant 0 : i32
    %c0_i32_0 = arith.constant 0 : i32
    return %arg0, %c0_i32, %arg2 : i32, i32, i32
  }
  func.func @transform_1(%arg0: i32, %arg1: i32, %arg2: i32) -> (i32, i32) {
    %c0_i32 = arith.constant 0 : i32
    return %arg2, %arg1 : i32, i32
  }
  func.func @transform_2(%arg0: i32, %arg1: i32, %arg2: i32) -> (i32, i32) {
    %c0_i32 = arith.constant 0 : i32
    %c0_i32_0 = arith.constant 0 : i32
    return %c0_i32, %arg1 : i32, i32
  }
  func.func @transform_3(%arg0: i32, %arg1: i32, %arg2: i32) -> (i32, i32, i32) {
    %c0_i32 = arith.constant 0 : i32
    %c0_i32_0 = arith.constant 0 : i32
    return %arg0, %c0_i32, %arg1 : i32, i32, i32
  }
}

</mosaic_0001>

<bundles_post_ra>
// kernel: tpu_custom_call.1
= control target key start
LH: loop header
LB: loop body
LE: loop exit
PB: predicated region body
PF: predicated region fallthrough
CT: control target
= control target key end

     0   :  { %8 = vsyncpa [#allocation4], 0  ;;  %s1127_s0 = inlined_call_operand.hbm [shape: f32[2,64,128], index: 0, kind: input, shape index: {}]   ;;  %s1128_s1 = inlined_call_operand.hbm [shape: f32[128,128], index: 1, kind: input, shape index: {}]   ;;  %s1129_s2 = inlined_call_operand.vmem [shape: f32[1,128], index: 2, kind: input, shape index: {}]   ;;  %s1130_s3 = inlined_call_operand.hbm [shape: f32[2,64,128], index: 3, kind: output, shape index: {}]  }
   0x1   :  { %10 = vsyncpa [#allocation4 + $0x1], 0 }
   0x2   :  { %11 = vsyncpa [#allocation7], 0 }
   0x3   :  { %12 = vsyncpa [#allocation5], 0 }
   0x4   :  { %14 = vsyncpa [#allocation5 + $0x1], 0  ;;  %s919_s12 = smov 0   ;;  %s921_s13 = smov 0  }
   0x5   :  { %s923_s14 = smov 0   ;;  %s925_s15 = smov 0  }
   0x6   :  { %s927_s16 = smov 0   ;;  %s929_s17 = smov 0  }
   0x7 LB: > { %s599_s2 = sadd.s32 4294967295, %s892_s17   ;;  %s600_s18 = sadd.s32 4294967294, %s892_s17   ;;  %s892_s17 = sphi %s929_s17, %s20_s17   ;;  %s888_s16 = sphi %s927_s16, %s1142_s16   ;;  %s884_s15 = sphi %s925_s15, %s1141_s15   ;;  %s880_s14 = sphi %s923_s14, %s1140_s14   ;;  %s876_s13 = sphi %s921_s13, %s1139_s13   ;;  %s872_s12 = sphi %s919_s12, %s1138_s12  }
   0x8   : > { %p61_p0 = scmp.ne.s32.totalorder %s876_s13, %s872_s12  ;;  %p953_p1 = scmp.eq.s32.totalorder %s599_s2, 0 }
   0x9   : > { %p957_p2 = scmp.eq.s32.totalorder %s599_s2, 1  ;;  %p147_p3 = scmp.eq.s32.totalorder %s600_s18, 1 }
   0xa   : > { %p963_p4 = por %p953_p1, %p61_p0  ;;  %p601_p5 = scmp.ge.s32.totalorder %s892_s17, 1 }
   0xb   : > { %p968_p6 = por %p147_p3, %p61_p0  ;;  %p154_p7 = scmp.lt.s32.totalorder %s892_s17, 3 }
   0xc   : > { %s169_s25 = sshll.u32 %s1128_s1, 4  ;;  %s894_s27 = smov [#allocation6]   ;;  %s170_s25 = int_to_ptr.hbm [resolvable:$true] %s169_s25 }
   0xd   : > { %p976_p8 = pnand %p601_p5, %p154_p7  ;;  %s171_s28 = sshll.u32 %s894_s27, 4  ;;  %s172_s28 = int_to_ptr.vmem [resolvable:$true] %s171_s28 }
   0xe   : > { %p604_p11 = scmp.ge.s32.totalorder %s892_s17, 2  ;;  %s895_s29 = smov 128  }
   0xf   : > { %p675_p9 = pneg %p976_p8  ;;  %s896_s30 = smov 8  }
  0x10   : > { %s39_s4 = sadd.s32 1, %s888_s16  ;;  %s48_s5 = sadd.s32 1, %s880_s14 }
  0x11   : > { %p676_p10 = pnand %p675_p9, %p953_p1  ;;  %p41_p12 = scmp.ge.s32.totalorder %s39_s4, 2 }
  0x12   : > { %p55_p13 = scmp.ne.s32.totalorder %s880_s14, %s876_s13  ;;  %p56_p0 = scmp.eq.s32.totalorder %s892_s17, 0 }
  0x13   : > { %678 = dma.hbm_to_vmem [thread:$0]  (!%p676_p10), %s170_s25, 2048, %s172_s28, [#allocation7], %s895_s29, %s895_s29, %s896_s30  }
  0x14   : > { %s1144_s4 = smov (%p41_p12, %s39_s4), 0  ;;  %p995_p3 = por %p56_p0, %p55_p13 }
  0x15   : > { %p1001_p5 = por %p957_p2, %p55_p13  ;;  %s43_s8 = ssub.s32 %s888_s16, %s1144_s4 }
  0x16   : > { %p688_p7 = scmp.lt.s32.totalorder %s892_s17, 2  ;;  %p46_p9 = scmp.eq.s32.totalorder %s43_s8, 0 }
  0x17   : > { %s191_s9 = sand.u32 1, %s880_s14   ;;  %s617_s2 = sshll.u32 %s888_s16, 6 }
  0x18   : > { %s605_s10 = sshll.u32 %s191_s9, 6  ;;  %s201_s24 = scalar_lea.hbm %s1127_s0, %s617_s2 }
  0x19   : > { %s1010_s11 = scalar_select %p46_p9, %s880_s14, %s48_s5  }
  0x1a   : > { %s195_s25 = scalar_lea.vmem [#allocation3], %s605_s10  ;;  %s202_s20 = sshll.u32 %s201_s24, 4  ;;  %s203_s20 = int_to_ptr.hbm [resolvable:$true] %s202_s20 }
  0x1b   : > { %s204_s27 = sshll.u32 %s195_s25, 4  ;;  %p680_p2 = pnand %p688_p7, %p995_p3  ;;  %s205_s27 = int_to_ptr.vmem [resolvable:$true] %s204_s27 }
  0x1c   : > { %s192_s28 = scalar_lea.sflag [#allocation4], %s191_s9  ;;  %216 = sbr.rel (%p976_p8) target bundleno = 273 (0x111), region = 32 }
  0x1d   : > { %682 = dma.hbm_to_vmem [thread:$0]  (!%p680_p2), %s203_s20, 1024, %s205_s27, %s192_s28, %s895_s29, %s895_s29, %s896_s30  }
  0x1e   : > { %s1024_s5 = sand.u32 (!%p976_p8), 1, %s876_s13  }
  0x1f   : > { %s609_s8 = sshll.u32 (!%p976_p8), %s1024_s5, 6  ;;  %s219_s10 = scalar_lea.sflag (!%p976_p8), [#allocation4], %s1024_s5 }
  0x20   : > { %s1030_s6 = scalar_lea.vmem (!%p976_p8), [#allocation3], %s609_s8 }
  0x21   : > { %859 = dma.done.wait (%p963_p4), %s219_s10, 1024  }
  0x22   : > { %861 = vsyncadd (%p963_p4), %s219_s10, 4294966272 }
  0x23   : > { %863 = dma.done.wait (%p953_p1), [#allocation7], 2048  }
  0x24   : > { %865 = vsyncadd (%p953_p1), [#allocation7], 4294965248  ;;  %v301_v0 = vld [vmem:[#allocation6 + $0x78] sm:$0xff]  ;;  %v300_v1 = vld [vmem:[#allocation6 + $0x70] sm:$0xff]  ;;  %s618_s19 = sshll.u32 %s884_s15, 6  ;;  %s253_s15 = scalar_lea.vmem [#allocation8], %s609_s8 }
  0x25   : > { %302 = vmatpush.msra.mxu0 %v301_v0  ;;  %620 = vmatpush.msra.mxu2 %v301_v0  ;;  %v299_v2 = vld [vmem:[#allocation6 + $0x68] sm:$0xff]  ;;  %v298_v3 = vld [vmem:[#allocation6 + $0x60] sm:$0xff]  ;;  %v297_v4 = vld [vmem:[#allocation6 + $0x58] sm:$0xff]  ;;  %s481_s29 = scalar_lea.hbm %s1130_s3, %s618_s19  ;;  %s482_s30 = sshll.u32 %s253_s15, 4  ;;  %s483_s30 = int_to_ptr.vmem [resolvable:$true] %s482_s30 }
  0x26   : > { %619 = vmatpush.msra.mxu1 %v301_v0  ;;  %621 = vmatpush.msra.mxu3 %v301_v0  ;;  %v296_v5 = vld [vmem:[#allocation6 + $0x50] sm:$0xff]  ;;  %v295_v6 = vld [vmem:[#allocation6 + $0x48] sm:$0xff]  ;;  %v294_v7 = vld [vmem:[#allocation6 + $0x40] sm:$0xff]  ;;  %s484_s9 = sshll.u32 %s481_s29, 4  ;;  %s469_s2 = scalar_lea.sflag [#allocation5], %s1024_s5  ;;  %s485_s9 = int_to_ptr.hbm [resolvable:$true] %s484_s9 }
  0x27   : > { %303 = vmatpush.msra.mxu0 %v300_v1  ;;  %623 = vmatpush.msra.mxu2 %v300_v1  ;;  %v293_v8 = vld [vmem:[#allocation6 + $0x38] sm:$0xff]  ;;  %v292_v9 = vld [vmem:[#allocation6 + $0x30] sm:$0xff]  ;;  %v291_v10 = vld [vmem:[#allocation6 + $0x28] sm:$0xff]  ;;  %s820_s18 = sshra.s32 %s485_s9, 4  ;;  %s826_s27 = scalar_lea.hbm %s1130_s3, 128  ;;  %s821_s18 = int_to_ptr.hbm [resolvable:$true] %s820_s18 }
  0x28   : > { %622 = vmatpush.msra.mxu1 %v300_v1  ;;  %624 = vmatpush.msra.mxu3 %v300_v1  ;;  %v290_v11 = vld [vmem:[#allocation6 + $0x20] sm:$0xff]  ;;  %v289_v12 = vld [vmem:[#allocation6 + $0x18] sm:$0xff]  ;;  %v288_v13 = vld [vmem:[#allocation6 + $0x10] sm:$0xff]  ;;  %s822_s23 = scalar_lea.hbm %s821_s18, 64  ;;  %p827_p10 = scmp.lt.s32.totalorder %s821_s18, %s1130_s3 }
  0x29   : > { %304 = vmatpush.msra.mxu0 %v299_v2  ;;  %626 = vmatpush.msra.mxu2 %v299_v2  ;;  %v287_v14 = vld [vmem:[#allocation6 + $0x8] sm:$0xff]  ;;  %v286_v15 = vld [vmem:[#allocation6] sm:$0xff]  ;;  %v280_v18 = vld [vmem:[%s1030_s6 + $0x10] sm:$0xff]  ;;  %p823_p1 = scmp.ne.s32.totalorder %s821_s18, %s822_s23  ;;  %p828_p12 = scmp.lt.s32.totalorder %s826_s27, %s822_s23 }
  0x2a   : > { %625 = vmatpush.msra.mxu1 %v299_v2  ;;  %627 = vmatpush.msra.mxu3 %v299_v2  ;;  %v278_v16 = vld [vmem:[%s1030_s6] sm:$0xff]  ;;  %v284_v19 = vld [vmem:[%s1030_s6 + $0x30] sm:$0xff]  ;;  %v279_v20 = vld [vmem:[%s1030_s6 + $0x8] sm:$0xff] }
  0x2b   : > { %305 = vmatpush.msra.mxu0 %v298_v3  ;;  %629 = vmatpush.msra.mxu2 %v298_v3  ;;  %v282_v17 = vld [vmem:[%s1030_s6 + $0x20] sm:$0xff]  ;;  %v283_v21 = vld [vmem:[%s1030_s6 + $0x28] sm:$0xff]  ;;  %v281_v22 = vld [vmem:[%s1030_s6 + $0x18] sm:$0xff]  ;;  %p824_p4 = pnand %p823_p1, %p1001_p5  ;;  %p829_p13 = por %p828_p12, %p827_p10 }
  0x2c   : > { %628 = vmatpush.msra.mxu1 %v298_v3  ;;  %630 = vmatpush.msra.mxu3 %v298_v3  ;;  %v285_v23 = vld [vmem:[%s1030_s6 + $0x38] sm:$0xff] }
  0x2d   : > { %306 = vmatpush.msra.mxu0 %v297_v4  ;;  %632 = vmatpush.msra.mxu2 %v297_v4  ;;  %p825_p8 = pneg %p824_p4 }
  0x2e   : > { %631 = vmatpush.msra.mxu1 %v297_v4  ;;  %633 = vmatpush.msra.mxu3 %v297_v4 }
  0x2f   : > { %307 = vmatpush.msra.mxu0 %v296_v5  ;;  %635 = vmatpush.msra.mxu2 %v296_v5  ;;  %p830_p0 = pnand %p829_p13, %p825_p8 }
  0x30   : > { %634 = vmatpush.msra.mxu1 %v296_v5  ;;  %636 = vmatpush.msra.mxu3 %v296_v5 }
  0x31   : > { %308 = vmatpush.msra.mxu0 %v295_v6  ;;  %638 = vmatpush.msra.mxu2 %v295_v6 }
  0x32   : > { %637 = vmatpush.msra.mxu1 %v295_v6  ;;  %639 = vmatpush.msra.mxu3 %v295_v6 }
  0x33   : > { %309 = vmatpush.msra.mxu0 %v294_v7  ;;  %641 = vmatpush.msra.mxu2 %v294_v7 }
  0x34   : > { %640 = vmatpush.msra.mxu1 %v294_v7  ;;  %642 = vmatpush.msra.mxu3 %v294_v7 }
  0x35   : > { %310 = vmatpush.msra.mxu0 %v293_v8  ;;  %644 = vmatpush.msra.mxu2 %v293_v8 }
  0x36   : > { %643 = vmatpush.msra.mxu1 %v293_v8  ;;  %645 = vmatpush.msra.mxu3 %v293_v8 }
  0x37   : > { %311 = vmatpush.msra.mxu0 %v292_v9  ;;  %647 = vmatpush.msra.mxu2 %v292_v9 }
  0x38   : > { %646 = vmatpush.msra.mxu1 %v292_v9  ;;  %648 = vmatpush.msra.mxu3 %v292_v9 }
  0x39   : > { %312 = vmatpush.msra.mxu0 %v291_v10  ;;  %650 = vmatpush.msra.mxu2 %v291_v10 }
  0x3a   : > { %649 = vmatpush.msra.mxu1 %v291_v10  ;;  %651 = vmatpush.msra.mxu3 %v291_v10 }
  0x3b   : > { %313 = vmatpush.msra.mxu0 %v290_v11  ;;  %653 = vmatpush.msra.mxu2 %v290_v11 }
  0x3c   : > { %652 = vmatpush.msra.mxu1 %v290_v11  ;;  %654 = vmatpush.msra.mxu3 %v290_v11 }
  0x3d   : > { %314 = vmatpush.msra.mxu0 %v289_v12  ;;  %656 = vmatpush.msra.mxu2 %v289_v12 }
  0x3e   : > { %655 = vmatpush.msra.mxu1 %v289_v12  ;;  %657 = vmatpush.msra.mxu3 %v289_v12 }
  0x3f   : > { %315 = vmatpush.msra.mxu0 %v288_v13  ;;  %659 = vmatpush.msra.mxu2 %v288_v13 }
  0x40   : > { %658 = vmatpush.msra.mxu1 %v288_v13  ;;  %660 = vmatpush.msra.mxu3 %v288_v13 }
  0x41   : > { %316 = vmatpush.msra.mxu0 %v287_v14  ;;  %662 = vmatpush.msra.mxu2 %v287_v14 }
  0x42   : > { %661 = vmatpush.msra.mxu1 %v287_v14  ;;  %663 = vmatpush.msra.mxu3 %v287_v14 }
  0x43   : > { %317 = vmatpush.msra.mxu0 %v286_v15  ;;  %665 = vmatpush.msra.mxu2 %v286_v15 }
  0x44   : > { %318 = vmatmul.f32.vlgmr.msra.gmra.mxu0 %v278_v16  ;;  %330 = vmatmul.f32.vlgmr.msra.gmra.mxu2 %v282_v17 }
  0x45   : > { %664 = vmatpush.msra.mxu1 %v286_v15  ;;  %666 = vmatpush.msra.mxu3 %v286_v15 }
  0x46   : > { %324 = vmatmul.f32.vlgmr.msra.gmra.mxu1 %v280_v18  ;;  %336 = vmatmul.f32.vlgmr.msra.gmra.mxu3 %v284_v19 }
  0x4c   : > { %321 = vmatmul.f32.gmra.mxu0 %v279_v20  ;;  %333 = vmatmul.f32.gmra.mxu2 %v283_v21 }
  0x4e   : > { %327 = vmatmul.f32.gmra.mxu1 %v281_v22  ;;  %339 = vmatmul.f32.gmra.mxu3 %v285_v23 }
  0xc1   : > { %v1048_v24 = vpop.f32.mrf.mxu0 }
  0xc2   : > { %v383_v29 = vmul.f32 %v1048_v24, %v1048_v24 }
  0xc3   : > { %v1050_v25 = vpop.f32.mrf.mxu1 }
  0xc4   : > { %v385_v33 = vmul.f32 %v1050_v25, %v1050_v25 }
  0xc7   : > { %v1052_v26 = vpop.f32.mrf.mxu2 }
  0xc8   : > { %v387_v40 = vmul.f32 %v1052_v26, %v1052_v26 }
  0xc9   : > { %v1054_v27 = vpop.f32.mrf.mxu0  ;;  %v1056_v28 = vpop.f32.mrf.mxu3 }
  0xca   : > { %v370_v30 = vadd.f32 %v1054_v27, %v1048_v24  ;;  %v384_v31 = vmul.f32 %v1054_v27, %v1054_v27  ;;  %v389_v47 = vmul.f32 %v1056_v28, %v1056_v28 }
  0xcb   : > { %v1064_v32 = vpop.f32.mrf.mxu1 }
  0xcc   : > { %v391_v34 = vadd.f32 %v384_v31, %v383_v29  ;;  %v371_v35 = vadd.f32 %v370_v30, %v1050_v25  ;;  %v386_v36 = vmul.f32 %v1064_v32, %v1064_v32 }
  0xce   : > { %v372_v37 = vadd.f32 %v371_v35, %v1064_v32  ;;  %v392_v38 = vadd.f32 %v391_v34, %v385_v33 }
  0xcf   : > { %v334_v39 = vpop.f32.mrf.mxu2 }
  0xd0   : > { %v393_v41 = vadd.f32 %v392_v38, %v386_v36  ;;  %v373_v42 = vadd.f32 %v372_v37, %v1052_v26  ;;  %v388_v43 = vmul.f32 %v334_v39, %v334_v39 }
  0xd1   : > { %v340_v44 = vpop.f32.mrf.mxu3 }
  0xd2   : > { %v374_v45 = vadd.f32 %v373_v42, %v334_v39  ;;  %v394_v46 = vadd.f32 %v393_v41, %v387_v40  ;;  %v390_v50 = vmul.f32 %v340_v44, %v340_v44 }
  0xd4   : > { %v395_v48 = vadd.f32 %v394_v46, %v388_v43  ;;  %v375_v49 = vadd.f32 %v374_v45, %v1056_v28 }
  0xd6   : > { %v376_v51 = vadd.f32 %v375_v49, %v340_v44  ;;  %v396_v52 = vadd.f32 %v395_v48, %v389_v47 }
  0xd8   : > { %v377_v53 = vrot.slane %v376_v51, 4  ;;  %v397_v54 = vadd.f32 %v396_v52, %v390_v50 }
  0xda   : > { %v378_v55 = vadd.f32 %v377_v53, %v376_v51  ;;  %v398_v56 = vrot.slane %v397_v54, 4 }
  0xdc   : > { %v379_v57 = vrot.slane %v378_v55, 2  ;;  %v399_v58 = vadd.f32 %v398_v56, %v397_v54 }
  0xde   : > { %v380_v59 = vadd.f32 %v379_v57, %v378_v55  ;;  %v400_v60 = vrot.slane %v399_v58, 2 }
  0xe0   : > { %v381_v61 = vrot.slane %v380_v59, 1  ;;  %v401_v62 = vadd.f32 %v400_v60, %v399_v58 }
  0xe2   : > { %v382_v63 = vadd.f32 %v381_v61, %v380_v59  ;;  %v402_v0 = vrot.slane %v401_v62, 1 }
  0xe4   : > { %v403_v1 = vadd.f32 %v402_v0, %v401_v62  ;;  %v404_v2 = vmul.f32 0.015625, %v382_v63 }
  0xe6   : > { %v405_v3 = vmul.f32 0.015625, %v403_v1  ;;  %v406_v4 = vmul.f32 %v404_v2, %v404_v2  ;;  %v409_v13 = vsub.f32 %v1048_v24, %v404_v2  ;;  %v410_v15 = vsub.f32 %v1054_v27, %v404_v2 }
  0xe7   : > { %v411_v16 = vsub.f32 %v1050_v25, %v404_v2  ;;  %v412_v17 = vsub.f32 %v1064_v32, %v404_v2  ;;  %v413_v18 = vsub.f32 %v1052_v26, %v404_v2  ;;  %v414_v19 = vsub.f32 %v334_v39, %v404_v2 }
  0xe8   : > { %v407_v5 = vsub.f32 %v405_v3, %v406_v4  ;;  %v415_v20 = vsub.f32 %v1056_v28, %v404_v2  ;;  %v416_v21 = vsub.f32 %v340_v44, %v404_v2 }
  0xea   : > { %v408_v6 = vmax.f32 %v407_v5, 0.0 }
  0xec   : > { %v417_v7 = vadd.f32 1e-05, %v408_v6 }
  0xee   : > { %744 = vrsqrt.f32 %v417_v7  ;;  %vm424_vm1 = vweird.f32 %v417_v7 }
  0xf4   : > { %v745_v8 = vpop.eup %744 }
  0xf5   : > { %v419_v9 = vmul.f32 %v745_v8, %v417_v7  ;;  %vm425_vm0 = vweird.f32 %v745_v8 }
  0xf6   : > { %vm426_vm2 = vmor %vm424_vm1, %vm425_vm0 }
  0xf7   : > { %v420_v10 = vmul.f32 %v745_v8, %v419_v9 }
  0xf9   : > { %v421_v11 = vmul.f32 0.5, %v420_v10 }
  0xfb   : > { %v422_v12 = vsub.f32 1.5, %v421_v11 }
  0xfd   : > { %v423_v14 = vmul.f32 %v745_v8, %v422_v12 }
  0xff   : > { %v427_v22 = vsel %vm426_vm2, %v745_v8, %v423_v14 }
 0x100   : > { %v428_v23 = vmul.f32 %v427_v22, %v409_v13  ;;  %v429_v29 = vmul.f32 %v427_v22, %v410_v15  ;;  %v430_v24 = vmul.f32 %v427_v22, %v411_v16  ;;  %v431_v30 = vmul.f32 %v427_v22, %v412_v17 }
 0x101   : > { %v432_v31 = vmul.f32 %v427_v22, %v413_v18  ;;  %v433_v33 = vmul.f32 %v427_v22, %v414_v19  ;;  %v434_v27 = vmul.f32 %v427_v22, %v415_v20  ;;  %v435_v34 = vmul.f32 %v427_v22, %v416_v21 }
 0x102   : > { %vm436_vm3 = vcmp.ge.f32.partialorder %v428_v23, 0.0  ;;  %vm437_vm4 = vcmp.ge.f32.partialorder %v429_v29, 0.0  ;;  %vm438_vm5 = vcmp.ge.f32.partialorder %v430_v24, 0.0  ;;  %vm439_vm6 = vcmp.ge.f32.partialorder %v431_v30, 0.0 }
 0x103   : > { %vm440_vm7 = vcmp.ge.f32.partialorder %v432_v31, 0.0  ;;  %v444_v25 = vmul.f32 0.2, %v428_v23  ;;  %v445_v26 = vmul.f32 0.2, %v429_v29  ;;  %vm441_vm8 = vcmp.ge.f32.partialorder %v433_v33, 0.0 }
 0x104   : > { %v446_v28 = vmul.f32 0.2, %v430_v24  ;;  %v447_v32 = vmul.f32 0.2, %v431_v30  ;;  %v448_v35 = vmul.f32 0.2, %v432_v31 }
 0x105   : > { %v449_v36 = vmul.f32 0.2, %v433_v33  ;;  %v450_v37 = vmul.f32 0.2, %v434_v27  ;;  %v452_v38 = vsel %vm436_vm3, %v428_v23, %v444_v25  ;;  %v453_v39 = vsel %vm437_vm4, %v429_v29, %v445_v26 }
 0x106   : > { %vm442_vm9 = vcmp.ge.f32.partialorder %v434_v27, 0.0  ;;  %v451_v40 = vmul.f32 0.2, %v435_v34  ;;  %v454_v41 = vsel %vm438_vm5, %v430_v24, %v446_v28  ;;  %v455_v42 = vsel %vm439_vm6, %v431_v30, %v447_v32  ;;  %460 = vst [vmem:[%s253_s15] sm:$0xff] %v452_v38 }
 0x107   : > { %vm443_vm10 = vcmp.ge.f32.partialorder %v435_v34, 0.0  ;;  %v456_v43 = vsel %vm440_vm7, %v432_v31, %v448_v35  ;;  %461 = vst [vmem:[%s253_s15 + $0x8] sm:$0xff] %v453_v39  ;;  %v457_v44 = vsel %vm441_vm8, %v433_v33, %v449_v36  ;;  %v458_v45 = vsel %vm442_vm9, %v434_v27, %v450_v37 }
 0x108   : > { %462 = vst [vmem:[%s253_s15 + $0x10] sm:$0xff] %v454_v41  ;;  %v459_v46 = vsel %vm443_vm10, %v435_v34, %v451_v40 }
 0x109   : > { %463 = vst [vmem:[%s253_s15 + $0x18] sm:$0xff] %v455_v42 }
 0x10a   : > { %464 = vst [vmem:[%s253_s15 + $0x20] sm:$0xff] %v456_v43 }
 0x10b   : > { %465 = vst [vmem:[%s253_s15 + $0x28] sm:$0xff] %v457_v44 }
 0x10c   : > { %466 = vst [vmem:[%s253_s15 + $0x30] sm:$0xff] %v458_v45 }
 0x10d   : > { %467 = vst [vmem:[%s253_s15 + $0x38] sm:$0xff] %v459_v46 }
 0x10e   : > { %833 = shalt.err (!%p830_p0)
}
 0x10f   : > { %s897_s5 = smov 128   ;;  %s898_s8 = smov 8  }
 0x110   : > { %673 = dma.vmem_to_hbm [thread:$0]  (%p1001_p5), %s483_s30, 1024, %s485_s9, %s469_s2, %s897_s5, %s897_s5, %s898_s8  }
 0x111 PF: > { %s499_s10 = sand.u32 1, %s872_s12   ;;  %p684_p3 = pnand %p604_p11, %p968_p6 }
 0x112   : > { %s500_s6 = scalar_lea.sflag [#allocation5], %s499_s10 }
 0x113   : > { %p685_p7 = pneg %p684_p3 }
 0x115   : > { %867 = dma.done.wait (%p685_p7), %s500_s6, 1024  }
 0x116   : > { %869 = vsyncadd (%p685_p7), %s500_s6, 4294966272  ;;  %s20_s17 = sadd.s32 1, %s892_s17   ;;  %s1138_s12 = smov %s876_s13 }
 0x117   : > { %p17_p9 = scmp.ge.s32.totalorder %s20_s17, 4   ;;  %s1139_s13 = smov %s880_s14 }
 0x118   : > { %s1140_s14 = smov %s1010_s11  ;;  %s1141_s15 = smov %s888_s16 }
 0x119   : > { %s1142_s16 = smov %s1144_s4  ;;  %19 = sbr.rel (!%p17_p9) target bundleno = 7 (0x7), region = 93 }
 0x11e   :  { %506 = vsyncpa [#allocation4], 1 }
 0x11f   :  { %508 = vsyncpa [#allocation4 + $0x1], 1 }
 0x120   :  { %509 = vsyncpa [#allocation7], 1 }
 0x121   :  { %510 = vsyncpa [#allocation5], 1 }
 0x122   :  { %512 = vsyncpa [#allocation5 + $0x1], 1 }

</bundles_post_ra>
